<compile_context>
chip_gen: v7x
topology: tpu7x:2x2x1
jax: 0.10.0
libtpu: 0.0.40
codegen_flags: <defaults>
</compile_context>

<pallas_src>
import jax
import jax.numpy as jnp
from jax import lax
from jax.experimental import pallas as pl
from jax.experimental.pallas import tpu as pltpu


# Finite stand-in for -inf on the streaming path so that a fully-masked key
# *block* cannot poison the running max with NaNs (later unmasked blocks wipe
# its contribution via the online-softmax rescale).
_MASK_VALUE = -0.7 * float(jnp.finfo(jnp.float32).max)


# ----------------------------------------------------------------------------
# Kernels
# ----------------------------------------------------------------------------
def _make_single_pass_kernel(has_mask, return_attn):
    """One grid step computes a full (block_b, block_q, Lk) attention slab."""

    def kernel(*refs):
        if has_mask:
            scale_ref, q_ref, k_ref, v_ref, mask_ref, *out_refs = refs
        else:
            scale_ref, q_ref, k_ref, v_ref, *out_refs = refs

        # QK^T contracting the shared Dk axis directly (no k.T / XLU
        # transpose); native-dtype operands, f32 accumulation on the MXU.
        scores = lax.dot_general(
            q_ref[...], k_ref[...],
            dimension_numbers=(((2,), (2,)), ((0,), (0,))),
            preferred_element_type=jnp.float32)            # (BB, TQ, Lk) f32
        scores = scores * scale_ref[0]                      # 1/temperature

        if has_mask:
            # masked_fill(mask, -inf): fully-masked rows give NaN, as torch.
            scores = jnp.where(mask_ref[...] != 0, -jnp.inf, scores)

        # Numerically stable softmax along the key axis (f32).
        m = jnp.max(scores, axis=-1, keepdims=True)
        e = jnp.exp(scores - m)
        denom = jnp.sum(e, axis=-1, keepdims=True)
        probs = e * pl.reciprocal(denom, approx=True)       # EUP slot, ~free

        out = lax.dot_general(
            probs.astype(v_ref.dtype), v_ref[...],
            dimension_numbers=(((2,), (1,)), ((0,), (0,))),
            preferred_element_type=jnp.float32)             # (BB, TQ, Dv) f32

        out_refs[0][...] = out.astype(out_refs[0].dtype)
        if return_attn:
            out_refs[1][...] = probs.astype(out_refs[1].dtype)

    return kernel


def _make_flash_kernel(has_mask):
    """Streaming (online-softmax) kernel: grid axis 2 walks key blocks."""

    def kernel(*refs):
        if has_mask:
            (scale_ref, q_ref, k_ref, v_ref, mask_ref, o_ref,
             m_sc, l_sc, acc_sc) = refs
        else:
            scale_ref, q_ref, k_ref, v_ref, o_ref, m_sc, l_sc, acc_sc = refs

        kv = pl.program_id(2)

        @pl.when(kv == 0)
        def _():
            m_sc[...] = jnp.full_like(m_sc, _MASK_VALUE)
            l_sc[...] = jnp.zeros_like(l_sc)
            acc_sc[...] = jnp.zeros_like(acc_sc)

        s = lax.dot_general(
            q_ref[...], k_ref[...],
            dimension_numbers=(((2,), (2,)), ((0,), (0,))),
            preferred_element_type=jnp.float32)             # (BB, TQ, TK) f32
        s = s * scale_ref[0]
        if has_mask:
            s = jnp.where(mask_ref[...] != 0, _MASK_VALUE, s)

        m_prev = m_sc[...]
        m_new = jnp.maximum(m_prev, jnp.max(s, axis=-1, keepdims=True))
        alpha = jnp.exp(m_prev - m_new)
        p = jnp.exp(s - m_new)
        l_sc[...] = alpha * l_sc[...] + jnp.sum(p, axis=-1, keepdims=True)
        acc_sc[...] = alpha * acc_sc[...] + lax.dot_general(
            p.astype(v_ref.dtype), v_ref[...],
            dimension_numbers=(((2,), (1,)), ((0,), (0,))),
            preferred_element_type=jnp.float32)
        m_sc[...] = m_new

        @pl.when(kv == pl.num_programs(2) - 1)
        def _():
            o_ref[...] = (acc_sc[...] *
                          pl.reciprocal(l_sc[...], approx=True)
                          ).astype(o_ref.dtype)

    return kernel


# ----------------------------------------------------------------------------
# Tiling heuristics / VMEM budgeting
# ----------------------------------------------------------------------------
def _largest_divisor_at_most(n, cap):
    for c in range(min(n, max(cap, 1)), 0, -1):
        if n % c == 0:
            return c
    return 1


def _choose_block_b(b, block_q):
    # Packing batch elements per grid step only amortizes the ~0.35us per-step
    # pipeline overhead (the batched dot_general still issues block_b separate
    # matmuls); keep the packed step around 256 query rows.
    target = max(1, 256 // max(block_q, 1))
    return _largest_divisor_at_most(b, target)


def _vmem_budget_bytes():
    cap = 64 * 1024 * 1024
    try:
        info_cap = int(pltpu.get_tpu_info().vmem_capacity_bytes)
        if info_cap > 0:
            cap = info_cap
    except Exception:
        pass
    # ~15% headroom for Mosaic internal scratch:
    # ~54 MiB on v7x (64 MiB physical), ~108 MiB on v5e/v6e (128 MiB).
    return int(cap * 0.85)


def _single_pass_bytes(bb, bq, lk, dk, dv, itemsize, has_mask,
                       return_attn, attn_itemsize):
    inp = bb * (bq * dk + lk * dk + lk * dv) * itemsize
    if has_mask:
        inp += bb * bq * lk                       # int8 mask block
    out = bb * bq * dv * itemsize
    if return_attn:
        out += bb * bq * lk * attn_itemsize
    temps = 3 * bb * bq * lk * 4                  # scores / e / probs (f32)
    return 2 * (inp + out) + temps                # double-buffered I/O


def _flash_bytes(bb, bq, bk, dk, dv, itemsize, has_mask):
    inp = bb * (bq * dk + bk * dk + bk * dv) * itemsize
    if has_mask:
        inp += bb * bq * bk
    out = bb * bq * dv * itemsize
    temps = 3 * bb * bq * bk * 4
    scratch = bb * bq * (dv + 2) * 4              # m / l / acc
    return 2 * (inp + out) + temps + scratch


def _fit_single_pass_blocks(b, lq, lk, dk, dv, itemsize, has_mask,
                            return_attn, attn_itemsize, budget):
    if lq <= 256:
        q_cands = [lq] + [c for c in (128, 64, 32, 16, 8)
                          if c < lq and lq % c == 0]
    else:
        q_cands = [c for c in (256, 128, 64, 32) if lq % c == 0] or [lq]
    best = None
    for bq in q_cands:
        bb = _choose_block_b(b, bq)
        while True:
            est = _single_pass_bytes(bb, bq, lk, dk, dv, itemsize, has_mask,
                                     return_attn, attn_itemsize)
            best = (bb, bq, est)
            if est <= budget:
                return best
            if bb == 1:
                break
            bb = _largest_divisor_at_most(b, max(bb // 2, 1))
    return best


def _choose_block_k(lk):
    for c in (512, 256, 128):
        if c < lk and lk % c == 0:
            return c
    return None


# ----------------------------------------------------------------------------
# Wrapper
# ----------------------------------------------------------------------------
def scaled_dot_product_attention(q, k, v, temperature, mask=None,
                                 return_attn=True, attn_dtype=None,
                                 block_k=None):
    """Pallas TPU equivalent of ScaledDotProductAttention.forward.

    q: (B, Lq, Dk), k: (B, Lk, Dk), v: (B, Lk, Dv)
    mask: optional boolean (or 0/1), broadcastable to (B, Lq, Lk); True
          entries are filled with -inf before the softmax (fully-masked rows
          give NaN on the single-pass path, matching torch masked_fill+softmax).
    return_attn=True  -> (output, attn)  [the module's semantics]
    return_attn=False -> output only; long Lk streams through a flash-style
                         online-softmax path with bounded VMEM.
    attn_dtype        -> dtype of the returned attn matrix (default: q.dtype;
                         pass jnp.bfloat16 to halve its HBM writeback).
    block_k           -> force the key-block size of the streaming path
                         (multiple of 128 dividing Lk; return_attn=False only).
    """
    B, Lq, Dk = q.shape
    _, Lk, _ = k.shape
    Dv = v.shape[-1]
    has_mask = mask is not None

    itemsize = jnp.dtype(q.dtype).itemsize
    attn_dt = jnp.dtype(attn_dtype) if attn_dtype is not None else jnp.dtype(q.dtype)

    # 1/temperature as an SMEM scalar: no recompilation per temperature value.
    scale = jnp.full((1,), 1.0 / float(temperature), dtype=jnp.float32)

    inputs = [scale, q, k, v]
    if has_mask:
        # int8 (1 B/elt) mask; the -inf fill happens in-kernel (VPU select).
        inputs.append(jnp.broadcast_to(mask, (B, Lq, Lk)).astype(jnp.int8))

    budget = _vmem_budget_bytes()
    bb, bq, est = _fit_single_pass_blocks(B, Lq, Lk, Dk, Dv, itemsize,
                                          has_mask, return_attn,
                                          attn_dt.itemsize, budget)

    # Decide whether to stream Lk (only possible when attn isn't returned,
    # since materializing attn requires the full key axis per query block).
    bk = None
    if not return_attn:
        if block_k is not None:
            if Lk % block_k != 0 or block_k % 128 != 0:
                raise ValueError("block_k must be a multiple of 128 dividing Lk")
            if block_k < Lk:
                bk = block_k
        elif est > budget:
            bk = _choose_block_k(Lk)
    use_flash = bk is not None

    smem_spec = pl.BlockSpec(memory_space=pltpu.MemorySpace.SMEM)

    # TODO(synk): lane-dense packing for Dv < 128 (processing several heads per
    # block so the trailing dim is a multiple of 128) belongs in the
    # MultiHeadAttention caller, not this per-head module.

    if not use_flash:
        grid = (B // bb, Lq // bq)
        vmem_limit = min(max(int(est * 1.5), 32 * 1024 * 1024), budget)

        in_specs = [
            smem_spec,                                                  # 1/T
            pl.BlockSpec((bb, bq, Dk), lambda b, i: (b, i, 0)),         # q
            pl.BlockSpec((bb, Lk, Dk), lambda b, i: (b, 0, 0)),         # k
            pl.BlockSpec((bb, Lk, Dv), lambda b, i: (b, 0, 0)),         # v
        ]
        if has_mask:
            in_specs.append(
                pl.BlockSpec((bb, bq, Lk), lambda b, i: (b, i, 0)))     # mask

        if return_attn:
            out_shape = (jax.ShapeDtypeStruct((B, Lq, Dv), q.dtype),
                         jax.ShapeDtypeStruct((B, Lq, Lk), attn_dt))
            out_specs = (
                pl.BlockSpec((bb, bq, Dv), lambda b, i: (b, i, 0)),
                pl.BlockSpec((bb, bq, Lk), lambda b, i: (b, i, 0)),
            )
        else:
            out_shape = jax.ShapeDtypeStruct((B, Lq, Dv), q.dtype)
            out_specs = pl.BlockSpec((bb, bq, Dv), lambda b, i: (b, i, 0))

        # Shard batch across TensorCores; only parallel-split Lq when there is
        # a single batch block (avoids duplicating per-batch K/V DMA on v7x).
        sem = ("parallel", "arbitrary") if grid[0] >= 2 else ("parallel", "parallel")

        return pl.pallas_call(
            _make_single_pass_kernel(has_mask, return_attn),
            out_shape=out_shape,
            grid_spec=pltpu.PrefetchScalarGridSpec(
                num_scalar_prefetch=0,
                grid=grid,
                in_specs=in_specs,
                out_specs=out_specs,
            ),
            compiler_params=pltpu.CompilerParams(
                dimension_semantics=sem,
                vmem_limit_bytes=vmem_limit,
            ),
        )(*inputs)

    # ---- streaming (flash-style) path: return_attn=False, Lk tiled ----
    bq = Lq if Lq <= 256 else next(
        (c for c in (256, 128, 64, 32) if Lq % c == 0), Lq)
    bb = _choose_block_b(B, bq)
    while bb > 1 and _flash_bytes(bb, bq, bk, Dk, Dv, itemsize,
                                  has_mask) > budget:
        bb = _largest_divisor_at_most(B, max(bb // 2, 1))
    est = _flash_bytes(bb, bq, bk, Dk, Dv, itemsize, has_mask)
    vmem_limit = min(max(int(est * 1.5), 32 * 1024 * 1024), budget)

    grid = (B // bb, Lq // bq, Lk // bk)
    in_specs = [
        smem_spec,                                                      # 1/T
        pl.BlockSpec((bb, bq, Dk), lambda b, i, kv: (b, i, 0)),         # q
        pl.BlockSpec((bb, bk, Dk), lambda b, i, kv: (b, kv, 0)),        # k
        pl.BlockSpec((bb, bk, Dv), lambda b, i, kv: (b, kv, 0)),        # v
    ]
    if has_mask:
        in_specs.append(
            pl.BlockSpec((bb, bq, bk), lambda b, i, kv: (b, i, kv)))    # mask
    out_specs = pl.BlockSpec((bb, bq, Dv), lambda b, i, kv: (b, i, 0))
    out_shape = jax.ShapeDtypeStruct((B, Lq, Dv), q.dtype)

    sem = ("parallel",
           "arbitrary" if grid[0] >= 2 else "parallel",
           "arbitrary")                                                  # Lk reduction

    return pl.pallas_call(
        _make_flash_kernel(has_mask),
        out_shape=out_shape,
        grid_spec=pltpu.PrefetchScalarGridSpec(
            num_scalar_prefetch=0,
            grid=grid,
            in_specs=in_specs,
            out_specs=out_specs,
            scratch_shapes=[
                pltpu.VMEM((bb, bq, 1), jnp.float32),    # running max
                pltpu.VMEM((bb, bq, 1), jnp.float32),    # running denom
                pltpu.VMEM((bb, bq, Dv), jnp.float32),   # running output
            ],
        ),
        compiler_params=pltpu.CompilerParams(
            dimension_semantics=sem,
            vmem_limit_bytes=vmem_limit,
        ),
    )(*inputs)


# ----------------------------------------------------------------------------
# Reference (plain JAX) for verification
# ----------------------------------------------------------------------------
def _reference(q, k, v, temperature, mask=None):
    attn = jnp.einsum("bqd,bkd->bqk", q, k) / temperature
    if mask is not None:
        attn = jnp.where(mask, -jnp.inf, attn)
    attn = jax.nn.softmax(attn, axis=2)
    out = jnp.einsum("bqk,bkd->bqd", attn, v)
    return out, attn


# ----------------------------------------------------------------------------
# Main
# ----------------------------------------------------------------------------
if __name__ == "__main__":
    # Loosened vs. an exact f32 reference: approximate EUP reciprocal in the
    # softmax denominator and (on the streaming path) online-softmax
    # re-association — expected, documented deviations.
    ATOL = RTOL = 2e-3

    keys = jax.random.split(jax.random.PRNGKey(0), 8)

    # --- small shape matching the module's typical per-head use -------------
    B, Lq, Lk, Dk, Dv = 2, 8, 8, 32, 32
    temperature = Dk ** 0.5
    q = jax.random.normal(keys[0], (B, Lq, Dk), dtype=jnp.float32)
    k = jax.random.normal(keys[1], (B, Lk, Dk), dtype=jnp.float32)
    v = jax.random.normal(keys[2], (B, Lk, Dv), dtype=jnp.float32)

    out, attn = scaled_dot_product_attention(q, k, v, temperature)
    jax.block_until_ready((out, attn))
    ref_out, ref_attn = _reference(q, k, v, temperature)
    assert jnp.allclose(out, ref_out, atol=ATOL, rtol=RTOL)
    assert jnp.allclose(attn, ref_attn, atol=ATOL, rtol=RTOL)

    # masked path (True == masked out with -inf); avoid fully-masked rows
    # (PyTorch would give NaN there anyway).
    mask = jax.random.bernoulli(keys[3], p=0.3, shape=(B, Lq, Lk))
    mask = mask.at[:, :, 0].set(False)
    out_m, attn_m = scaled_dot_product_attention(q, k, v, temperature, mask=mask)
    jax.block_until_ready((out_m, attn_m))
    ref_out_m, ref_attn_m = _reference(q, k, v, temperature, mask=mask)
    assert jnp.allclose(out_m, ref_out_m, atol=ATOL, rtol=RTOL)
    assert jnp.allclose(attn_m, ref_attn_m, atol=ATOL, rtol=RTOL)

    # output-only fast path (skips the attn HBM writeback entirely)
    out_only = scaled_dot_product_attention(q, k, v, temperature, mask=mask,
                                            return_attn=False)
    jax.block_until_ready(out_only)
    assert jnp.allclose(out_only, ref_out_m, atol=ATOL, rtol=RTOL)

    # --- streaming (flash) path: output-only, Lk tiled over the grid --------
    B2, Lq2, Lk2, D2 = 2, 128, 256, 64
    temperature2 = D2 ** 0.5
    q2 = jax.random.normal(keys[4], (B2, Lq2, D2), dtype=jnp.float32)
    k2 = jax.random.normal(keys[5], (B2, Lk2, D2), dtype=jnp.float32)
    v2 = jax.random.normal(keys[6], (B2, Lk2, D2), dtype=jnp.float32)
    mask2 = jax.random.bernoulli(keys[7], p=0.3, shape=(B2, Lq2, Lk2))
    mask2 = mask2.at[:, :, 0].set(False)

    out2 = scaled_dot_product_attention(q2, k2, v2, temperature2, mask=mask2,
                                        return_attn=False, block_k=128)
    jax.block_until_ready(out2)
    ref_out2, _ = _reference(q2, k2, v2, temperature2, mask=mask2)
    assert jnp.allclose(out2, ref_out2, atol=ATOL, rtol=RTOL)

    print("KERNEL_OK")
</pallas_src>

<mosaic_0001>
module attributes {stable_mosaic.version = 11 : i64} {
  func.func @kernel(%arg0: i32, %arg1: i32, %arg2: memref<1xf32, #tpu.memory_space<smem>>, %arg3: memref<2x8x32xf32, #tpu.memory_space<vmem>>, %arg4: memref<2x8x32xf32, #tpu.memory_space<vmem>>, %arg5: memref<2x8x32xf32, #tpu.memory_space<vmem>>, %arg6: memref<2x8x32xf32, #tpu.memory_space<vmem>>, %arg7: memref<2x8x8xf32, #tpu.memory_space<vmem>>) attributes {dimension_semantics = [#tpu.dimension_semantics<parallel>, #tpu.dimension_semantics<parallel>], iteration_bounds = array<i64: 1, 1>, scalar_prefetch = 0 : i64, scratch_operands = 0 : i64, tpu.core_type = #tpu.core_type<tc>, window_params = [{transform_indices = @transform_0, window_bounds = array<i64: 1>}, {transform_indices = @transform_1, window_bounds = array<i64: 2, 8, 32>}, {transform_indices = @transform_2, window_bounds = array<i64: 2, 8, 32>}, {transform_indices = @transform_3, window_bounds = array<i64: 2, 8, 32>}, {transform_indices = @transform_4, window_bounds = array<i64: 2, 8, 32>}, {transform_indices = @transform_5, window_bounds = array<i64: 2, 8, 8>}]} {
    %c0 = arith.constant 0 : index
    %c0_0 = arith.constant 0 : index
    %c0_1 = arith.constant 0 : index
    %0 = vector.load %arg3[%c0, %c0_0, %c0_1] : memref<2x8x32xf32, #tpu.memory_space<vmem>>, vector<2x8x32xf32>
    %c0_2 = arith.constant 0 : index
    %c0_3 = arith.constant 0 : index
    %c0_4 = arith.constant 0 : index
    %1 = vector.load %arg4[%c0_2, %c0_3, %c0_4] : memref<2x8x32xf32, #tpu.memory_space<vmem>>, vector<2x8x32xf32>
    %cst = arith.constant dense<0.000000e+00> : vector<2x8x8xf32>
    %2 = tpu.matmul %0, %1, %cst {dimension_numbers = #tpu.dot_dimension_numbers<[2], [2], [1], [1], [0, 0, 0, 1, 1, 1], [0], [0]>} : vector<2x8x32xf32>, vector<2x8x32xf32>, vector<2x8x8xf32> -> vector<2x8x8xf32>
    %c0_5 = arith.constant 0 : index
    %3 = memref.load %arg2[%c0_5] : memref<1xf32, #tpu.memory_space<smem>>
    %4 = vector.broadcast %3 : f32 to vector<2x8x8xf32>
    %5 = arith.mulf %2, %4 : vector<2x8x8xf32>
    %cst_6 = arith.constant dense<0xFF800000> : vector<2x8xf32>
    %6 = vector.multi_reduction <maximumf>, %5, %cst_6 [2] : vector<2x8x8xf32> to vector<2x8xf32>
    %7 = vector.shape_cast %6 : vector<2x8xf32> to vector<2x8x1xf32>
    %8 = vector.broadcast %7 : vector<2x8x1xf32> to vector<2x8x8xf32>
    %9 = arith.subf %5, %8 : vector<2x8x8xf32>
    %10 = math.exp %9 : vector<2x8x8xf32>
    %cst_7 = arith.constant dense<0.000000e+00> : vector<2x8xf32>
    %11 = vector.multi_reduction <add>, %10, %cst_7 [2] : vector<2x8x8xf32> to vector<2x8xf32>
    %12 = vector.shape_cast %11 : vector<2x8xf32> to vector<2x8x1xf32>
    %13 = tpu.reciprocal %12 {approx = true} : vector<2x8x1xf32> -> vector<2x8x1xf32>
    %14 = vector.broadcast %13 : vector<2x8x1xf32> to vector<2x8x8xf32>
    %15 = arith.mulf %10, %14 : vector<2x8x8xf32>
    %c0_8 = arith.constant 0 : index
    %c0_9 = arith.constant 0 : index
    %c0_10 = arith.constant 0 : index
    %16 = vector.load %arg5[%c0_8, %c0_9, %c0_10] : memref<2x8x32xf32, #tpu.memory_space<vmem>>, vector<2x8x32xf32>
    %cst_11 = arith.constant dense<0.000000e+00> : vector<2x8x32xf32>
    %17 = tpu.matmul %15, %16, %cst_11 {dimension_numbers = #tpu.dot_dimension_numbers<[2], [1], [1], [2], [0, 0, 0, 1, 1, 2], [0], [0]>} : vector<2x8x8xf32>, vector<2x8x32xf32>, vector<2x8x32xf32> -> vector<2x8x32xf32>
    %c0_12 = arith.constant 0 : index
    %c0_13 = arith.constant 0 : index
    %c0_14 = arith.constant 0 : index
    %18 = vector.load %arg6[%c0_12, %c0_13, %c0_14] : memref<2x8x32xf32, #tpu.memory_space<vmem>>, vector<2x8x32xf32>
    tpu.vector_store %arg6[%c0_12, %c0_13, %c0_14], %17 {strides = array<i32>} : memref<2x8x32xf32, #tpu.memory_space<vmem>>, vector<2x8x32xf32>,
    %c0_15 = arith.constant 0 : index
    %c0_16 = arith.constant 0 : index
    %c0_17 = arith.constant 0 : index
    %19 = vector.load %arg7[%c0_15, %c0_16, %c0_17] : memref<2x8x8xf32, #tpu.memory_space<vmem>>, vector<2x8x8xf32>
    tpu.vector_store %arg7[%c0_15, %c0_16, %c0_17], %15 {strides = array<i32>} : memref<2x8x8xf32, #tpu.memory_space<vmem>>, vector<2x8x8xf32>,
    return
  }
  func.func @transform_0(%arg0: i32, %arg1: i32) -> i32 {
    %c0_i32 = arith.constant 0 : i32
    %c0_i32_0 = arith.constant 0 : i32
    return %c0_i32 : i32
  }
  func.func @transform_1(%arg0: i32, %arg1: i32) -> (i32, i32, i32) {
    %c0_i32 = arith.constant 0 : i32
    %c0_i32_0 = arith.constant 0 : i32
    return %arg0, %arg1, %c0_i32 : i32, i32, i32
  }
  func.func @transform_2(%arg0: i32, %arg1: i32) -> (i32, i32, i32) {
    %c0_i32 = arith.constant 0 : i32
    %c0_i32_0 = arith.constant 0 : i32
    %c0_i32_1 = arith.constant 0 : i32
    return %arg0, %c0_i32, %c0_i32_0 : i32, i32, i32
  }
  func.func @transform_3(%arg0: i32, %arg1: i32) -> (i32, i32, i32) {
    %c0_i32 = arith.constant 0 : i32
    %c0_i32_0 = arith.constant 0 : i32
    %c0_i32_1 = arith.constant 0 : i32
    return %arg0, %c0_i32, %c0_i32_0 : i32, i32, i32
  }
  func.func @transform_4(%arg0: i32, %arg1: i32) -> (i32, i32, i32) {
    %c0_i32 = arith.constant 0 : i32
    %c0_i32_0 = arith.constant 0 : i32
    return %arg0, %arg1, %c0_i32 : i32, i32, i32
  }
  func.func @transform_5(%arg0: i32, %arg1: i32) -> (i32, i32, i32) {
    %c0_i32 = arith.constant 0 : i32
    %c0_i32_0 = arith.constant 0 : i32
    return %arg0, %arg1, %c0_i32 : i32, i32, i32
  }
}

</mosaic_0001>

<bundles_post_ra>
// kernel: tpu_custom_call.1
= control target key start
LH: loop header
LB: loop body
LE: loop exit
PB: predicated region body
PF: predicated region fallthrough
CT: control target
= control target key end

     0   :  { %12 = vsyncpa [#allocation4], 0  ;;  %s744_s0 = inlined_call_operand.<no memory space> [shape: f32[1], index: 0, kind: input, shape index: {}]   ;;  %s745_s1 = inlined_call_operand.hbm [shape: f32[2,8,32], index: 1, kind: input, shape index: {}]   ;;  %s746_s2 = inlined_call_operand.hbm [shape: f32[2,8,32], index: 2, kind: input, shape index: {}]   ;;  %s747_s3 = inlined_call_operand.hbm [shape: f32[2,8,32], index: 3, kind: input, shape index: {}]   ;;  %s748_s4 = inlined_call_operand.hbm [shape: f32[2,8,32], index: 4, kind: output, shape index: {0}]   ;;  %s749_s5 = inlined_call_operand.hbm [shape: f32[2,8,8], index: 5, kind: output, shape index: {1}]  }
   0x1   :  { %13 = vsyncpa [#allocation7], 0 }
   0x2   :  { %14 = vsyncpa [#allocation5], 0 }
   0x3   :  { %15 = vsyncpa [#allocation11], 0  ;;  %s602_s18 = smov [#allocation6]   ;;  %s603_s20 = smov [#allocation3]  }
   0x4   :  { %s35_s19 = sshll.u32 %s602_s18, 4  ;;  %s23_s21 = sshll.u32 %s603_s20, 4  ;;  %s36_s19 = int_to_ptr.vmem [resolvable:$true] %s35_s19  ;;  %s641_s21 = int_to_ptr.vmem [resolvable:$true] %s23_s21 }
   0x5   :  { %s484_s24 = scalar_lea.hbm %s746_s2, 256 }
   0x6   :  { %p485_p0 = scmp.ne.s32.totalorder %s746_s2, %s484_s24  ;;  %p488_p1 = scmp.lt.u32.totalorder %s484_s24, %s746_s2 }
   0x8   :  { %p490_p2 = pnand %p488_p1, %p485_p0 }
   0xa   :  { %493 = shalt.err (!%p490_p2)
}
   0xb   :  { %s494_s29 = scalar_lea.vmem %s36_s19, 256  ;;  %p499_p4 = scmp.lt.s32.totalorder %s36_s19, %s36_s19 }
   0xc   :  { %p495_p3 = scmp.ne.s32.totalorder %s36_s19, %s494_s29  ;;  %p500_p5 = scmp.lt.s32.totalorder %s494_s29, %s494_s29 }
   0xe   :  { %p501_p6 = por %p500_p5, %p499_p4 }
  0x10   :  { %p502_p7 = pnand %p501_p6, %p495_p3 }
  0x12   :  { %505 = shalt.err (!%p502_p7)
}
  0x13   :  { %s604_s30 = smov 128   ;;  %s605_s6 = smov 8  }
  0x14   :  { %41 = dma.hbm_to_vmem [thread:$0]  %s746_s2, 256, %s36_s19, [#allocation7], %s604_s30, %s604_s30, %s605_s6  }
  0x15   :  { %s506_s11 = scalar_lea.hbm %s745_s1, 256 }
  0x16   :  { %p507_p8 = scmp.ne.s32.totalorder %s745_s1, %s506_s11  ;;  %p510_p9 = scmp.lt.u32.totalorder %s506_s11, %s745_s1 }
  0x18   :  { %p512_p10 = pnand %p510_p9, %p507_p8 }
  0x1a   :  { %515 = shalt.err (!%p512_p10)
}
  0x1b   :  { %s516_s16 = scalar_lea.vmem %s641_s21, 256  ;;  %p521_p12 = scmp.lt.s32.totalorder %s641_s21, %s641_s21 }
  0x1c   :  { %p517_p11 = scmp.ne.s32.totalorder %s641_s21, %s516_s16  ;;  %p522_p13 = scmp.lt.s32.totalorder %s516_s16, %s516_s16 }
  0x1e   :  { %p523_p0 = por %p522_p13, %p521_p12 }
  0x20   :  { %p524_p1 = pnand %p523_p0, %p517_p11 }
  0x22   :  { %527 = shalt.err (!%p524_p1)
}
  0x23   :  { %29 = dma.hbm_to_vmem [thread:$0]  %s745_s1, 256, %s641_s21, [#allocation4], %s604_s30, %s604_s30, %s605_s6  }
  0x24   :  { %s606_s18 = smov [#allocation8]   ;;  %s528_s23 = scalar_lea.hbm %s747_s3, 256 }
  0x25   :  { %s47_s19 = sshll.u32 %s606_s18, 4  ;;  %p529_p2 = scmp.ne.s32.totalorder %s747_s3, %s528_s23  ;;  %s48_s19 = int_to_ptr.vmem [resolvable:$true] %s47_s19 }
  0x26   :  { %p532_p3 = scmp.lt.u32.totalorder %s528_s23, %s747_s3 }
  0x28   :  { %p534_p4 = pnand %p532_p3, %p529_p2 }
  0x2a   :  { %537 = shalt.err (!%p534_p4)
}
  0x2b   :  { %s538_s28 = scalar_lea.vmem %s48_s19, 256  ;;  %p543_p6 = scmp.lt.s32.totalorder %s48_s19, %s48_s19 }
  0x2c   :  { %p539_p5 = scmp.ne.s32.totalorder %s48_s19, %s538_s28  ;;  %p544_p7 = scmp.lt.s32.totalorder %s538_s28, %s538_s28 }
  0x2e   :  { %p545_p8 = por %p544_p7, %p543_p6 }
  0x30   :  { %p546_p9 = pnand %p545_p8, %p539_p5 }
  0x32   :  { %549 = shalt.err (!%p546_p9)
}
  0x33   :  { %53 = dma.hbm_to_vmem [thread:$0]  %s747_s3, 256, %s48_s19, [#allocation7], %s604_s30, %s604_s30, %s605_s6  }
  0x34   :  { %594 = dma.done.wait [#allocation4], 256  }
  0x35   :  { %595 = vsyncadd [#allocation4], 4294967040 }
  0x36   :  { %596 = dma.done.wait [#allocation7], 512  }
  0x37   :  { %597 = vsyncadd [#allocation7], 4294966784  ;;  %v607_v0 = vmov 0.0   ;;  %vm608_vm0 = vmmov 0   ;;  %vm67_vm1 = vcmask 261120   ;;  %v65_v1 = vld [vmem:[#allocation6] sm:$0xff]  ;;  %v221_v5 = vstv %s744_s0 }
  0x38   :  { %447 = vmatprep.subr.mxu0 %v607_v0  ;;  %449 = vmatprep.mubr.msk.f32.mxu0 %vm608_vm0, %v607_v0  ;;  %v66_v2 = vld [vmem:[#allocation6 + $0x8] sm:$0xff]  ;;  %v63_v3 = vld [vmem:[#allocation3] sm:$0xff]  ;;  %v64_v4 = vld [vmem:[#allocation3 + $0x8] sm:$0xff]  ;;  %vm224_vm2 = vcmask 64512   ;;  %s609_s0 = smov [#allocation10]  }
  0x39   :  { %452 = vmatprep.subr.mxu1 %v607_v0  ;;  %454 = vmatprep.mubr.msk.f32.mxu1 %vm608_vm0, %v607_v0  ;;  %v247_v24 = vld [vmem:[#allocation8] sm:$0xff]  ;;  %v248_v25 = vld [vmem:[#allocation8 + $0x8] sm:$0xff]  ;;  %s416_s7 = sshll.u32 %s609_s0, 4  ;;  %s417_s7 = int_to_ptr.vmem [resolvable:$true] %s416_s7 }
  0x3a   :  { %448 = vmatpush3.xpose.msk.msra.mxu0 %vm67_vm1, %v65_v1  ;;  %453 = vmatpush3.xpose.msk.msra.mxu1 %vm67_vm1, %v66_v2  ;;  %s550_s8 = scalar_lea.vmem %s417_s7, 256  ;;  %p555_p11 = scmp.lt.s32.totalorder %s417_s7, %s417_s7 }
  0x3b   :  { %457 = vmatprep.subr.mxu0 %v607_v0  ;;  %462 = vmatprep.subr.mxu1 %v607_v0  ;;  %p551_p10 = scmp.ne.s32.totalorder %s417_s7, %s550_s8  ;;  %p556_p12 = scmp.lt.s32.totalorder %s550_s8, %s550_s8 }
  0x3d   :  { %450 = vmatmul.mubr.msk.f32.vlgmr.msra.gmra.mrb[0].mxu0 %vm67_vm1, %v63_v3  ;;  %455 = vmatmul.mubr.msk.f32.vlgmr.msra.gmra.mrb[0].mxu1 %vm67_vm1, %v64_v4  ;;  %p557_p13 = por %p556_p12, %p555_p11 }
  0x3e   :  { %459 = vmatprep.mubr.msk.f32.mxu0 %vm608_vm0, %v607_v0  ;;  %464 = vmatprep.mubr.msk.f32.mxu1 %vm608_vm0, %v607_v0 }
  0x3f   :  { %458 = vmatpush3.msra.mxu0 %v247_v24  ;;  %463 = vmatpush3.msra.mxu1 %v248_v25  ;;  %p558_p0 = pnand %p557_p13, %p551_p10 }
 0x110   :  { %v140_v6 = vpop.f32.mrb[0].mxu0  ;;  %v216_v7 = vpop.f32.mrb[0].mxu1 }
 0x111   :  { %v222_v8 = vmul.f32 %v221_v5, %v140_v6  ;;  %v451_v9 = vpop.f32.mrb[1].mxu0  ;;  %v223_v10 = vmul.f32 %v221_v5, %v216_v7  ;;  %v456_v11 = vpop.f32.mrb[1].mxu1 }
 0x113   :  { %v225_v12 = vsel %vm224_vm2, %v222_v8, -inf  ;;  %v228_v13 = vsel %vm224_vm2, %v223_v10, -inf }
 0x114   :  { %226 = vmax.xlane.f32.xlu0 %v225_v12 }
 0x118   :  { %229 = vmax.xlane.f32.xlu0 %v228_v13 }
 0x1a1   :  { %v227_v14 = vpop.xlane.xlu0 %226 }
 0x1a2   :  { %v231_v15 = vsub.f32 %v222_v8, %v227_v14 }
 0x1a4   :  { %v233_v16 = vmul.f32 1.442695, %v231_v15 }
 0x1a5   :  { %v230_v17 = vpop.xlane.xlu0 %229 }
 0x1a6   :  { %476 = vpow2.f32 %v233_v16  ;;  %v232_v18 = vsub.f32 %v223_v10, %v230_v17 }
 0x1a8   :  { %v235_v19 = vmul.f32 1.442695, %v232_v18 }
 0x1aa   :  { %478 = vpow2.f32 %v235_v19 }
 0x1b0   :  { %v477_v20 = vpop.eup %476 }
 0x1b1   :  { %v237_v21 = vsel %vm224_vm2, %v477_v20, 0.0 }
 0x1b2   :  { %238 = vadd.xlane.f32.xlu1 %v237_v21 }
 0x1b4   :  { %v479_v22 = vpop.eup %478 }
 0x1b5   :  { %v240_v23 = vsel %vm224_vm2, %v479_v22, 0.0 }
 0x1b6   :  { %241 = vadd.xlane.f32.xlu1 %v240_v23 }
 0x23f   :  { %v239_v26 = vpop.xlane.xlu1 %238 }
 0x240   :  { %480 = vrcp.f32 %v239_v26 }
 0x243   :  { %v242_v27 = vpop.xlane.xlu1 %241 }
 0x244   :  { %482 = vrcp.f32 %v242_v27 }
 0x24a   :  { %v481_v28 = vpop.eup %480 }
 0x24b   :  { %v245_v29 = vmul.f32 %v481_v28, %v477_v20 }
 0x24d   :  { %397 = vst.msk [vmem:[#allocation10] sm:$0xff] %vm224_vm2, %v245_v29  ;;  %460 = vmatmul.mubr.msk.f32.vlgmr.msra.gmra.mrb[2].mxu0 %vm224_vm2, %v245_v29 }
 0x24e   :  { %v483_v30 = vpop.eup %482 }
 0x24f   :  { %v246_v31 = vmul.f32 %v483_v30, %v479_v22 }
 0x251   :  { %398 = vst.msk [vmem:[#allocation10 + $0x8] sm:$0xff] %vm224_vm2, %v246_v31  ;;  %465 = vmatmul.mubr.msk.f32.vlgmr.msra.gmra.mrb[2].mxu1 %vm224_vm2, %v246_v31 }
 0x252   :  { %561 = shalt.err (!%p558_p0)
}
 0x253   :  { %s562_s11 = scalar_lea.hbm %s749_s5, 256 }
 0x254   :  { %p563_p1 = scmp.ne.s32.totalorder %s749_s5, %s562_s11  ;;  %p566_p2 = scmp.lt.u32.totalorder %s562_s11, %s749_s5 }
 0x256   :  { %p568_p3 = pnand %p566_p2, %p563_p1 }
 0x258   :  { %571 = shalt.err (!%p568_p3)
}
 0x259   :  { %422 = dma.vmem_to_hbm [thread:$0]  %s417_s7, 256, %s749_s5, [#allocation11], %s604_s30, %s604_s30, %s605_s6  }
 0x25a   :  { %s610_s17 = smov [#allocation9]  }
 0x25b   :  { %s404_s18 = sshll.u32 %s610_s17, 4  ;;  %s405_s18 = int_to_ptr.vmem [resolvable:$true] %s404_s18 }
 0x25c   :  { %s572_s19 = scalar_lea.vmem %s405_s18, 256  ;;  %p577_p5 = scmp.lt.s32.totalorder %s405_s18, %s405_s18 }
 0x25d   :  { %p573_p4 = scmp.ne.s32.totalorder %s405_s18, %s572_s19  ;;  %p578_p6 = scmp.lt.s32.totalorder %s572_s19, %s572_s19 }
 0x25f   :  { %p579_p7 = por %p578_p6, %p577_p5 }
 0x261   :  { %p580_p8 = pnand %p579_p7, %p573_p4 }
 0x320   :  { %v318_v32 = vpop.f32.mrb[2].mxu0 }
 0x321   :  { %395 = vst.msk [vmem:[#allocation9] sm:$0xff] %vm67_vm1, %v318_v32  ;;  %v461_v33 = vpop.f32.mrb[3].mxu0 }
 0x324   :  { %v391_v34 = vpop.f32.mrb[2].mxu1 }
 0x325   :  { %396 = vst.msk [vmem:[#allocation9 + $0x8] sm:$0xff] %vm67_vm1, %v391_v34  ;;  %v466_v35 = vpop.f32.mrb[3].mxu1 }
 0x326   :  { %583 = shalt.err (!%p580_p8)
}
 0x327   :  { %s584_s22 = scalar_lea.hbm %s748_s4, 256 }
 0x328   :  { %p585_p9 = scmp.ne.s32.totalorder %s748_s4, %s584_s22  ;;  %p588_p10 = scmp.lt.u32.totalorder %s584_s22, %s748_s4 }
 0x32a   :  { %p590_p11 = pnand %p588_p10, %p585_p9 }
 0x32c   :  { %593 = shalt.err (!%p590_p11)
}
 0x32d   :  { %410 = dma.vmem_to_hbm [thread:$0]  %s405_s18, 256, %s748_s4, [#allocation5], %s604_s30, %s604_s30, %s605_s6  }
 0x32e   :  { %598 = dma.done.wait [#allocation5], 256  }
 0x32f   :  { %599 = vsyncadd [#allocation5], 4294967040 }
 0x330   :  { %600 = dma.done.wait [#allocation11], 256  }
 0x331   :  { %601 = vsyncadd [#allocation11], 4294967040 }
 0x332   :  { %429 = vsyncpa [#allocation4], 1 }
 0x333   :  { %430 = vsyncpa [#allocation7], 1 }
 0x334   :  { %431 = vsyncpa [#allocation5], 1 }
 0x335   :  { %432 = vsyncpa [#allocation11], 1 }

</bundles_post_ra>
